<compile_context>
chip_gen: v7x
topology: tpu7x:2x2x1
jax: 0.10.0
libtpu: 0.0.40
codegen_flags: <defaults>
</compile_context>

<pallas_src>
import functools

import jax
import jax.numpy as jnp
from jax import lax
from jax.experimental import pallas as pl
from jax.experimental.pallas import tpu as pltpu

BATCH_NORM_EPSILON = 1e-05

# Per-x-tile byte budget for the tiled two-pass path.  Measured f32 elementwise
# kernels reach 85%+ of HBM roofline once tiles hit the 1-4 MiB range; 4 MiB
# keeps pass-2 buffering (2 in + 2 out = 4x tile ~ 16 MiB) well inside the
# scoped-VMEM limit below on every generation (v7x has only 64 MiB physical).
_TILE_BUDGET_BYTES = 4 * 1024 * 1024
# Fused single-pass fast path threshold (x counted at f32 width): conservative
# so in/out buffers plus f32 compute temporaries stay far under the VMEM limit.
_FUSED_MAX_BYTES = 4 * 1024 * 1024
_VMEM_LIMIT_BYTES = 48 * 1024 * 1024


def _round_down(x, m):
    return (x // m) * m


def _round_up(x, m):
    return ((x + m - 1) // m) * m


def _select_tiles(nc, hw, itemsize, budget_bytes):
    """Pick (row_tile, hw_tile): maximize the lane (hw) dim first, then grow the
    row dim to fill a per-tile byte budget."""
    row_unit = max(8, 32 // itemsize)          # sublane granule: 8/16/32 for 4/2/1-byte
    budget_elems = max(budget_bytes // itemsize, row_unit * 128)

    if hw % 128 != 0 or hw * row_unit <= budget_elems:
        # Full lane extent (always a legal block last-dim, even when hw is not a
        # multiple of 128 or does not fit the budget).
        # TODO(synk): hw not a multiple of 128 lowers to masked stores; folding
        # rows into lanes would keep stores lane-dense for 7x7/14x14 layers.
        hw_tile = hw
    else:
        hw_tile = max(128, min(_round_down(budget_elems // row_unit, 128), hw))

    row_tile = min(nc, _round_down(max(budget_elems // hw_tile, row_unit), row_unit))
    if row_tile <= 0 or row_tile >= nc:
        row_tile = nc                          # full dim is always legal

    # Give the (parallel) row axis at least two blocks when possible so both
    # v7x TensorCores get work in the stats pass.
    if pl.cdiv(nc, row_tile) < 2 and nc >= 2 * row_unit:
        row_tile = _round_up(pl.cdiv(nc, 2), row_unit)

    return row_tile, hw_tile


# --------------------------- fused single-pass path ---------------------------


def _fused_kernel(x_ref, gamma_ref, beta_ref, o_ref, *, inv_count, eps):
    """Whole activation resident in VMEM: stats + normalize + affine + ReLU."""
    x = x_ref[...].astype(jnp.float32)                 # (N, C, HW)
    xs = jnp.sum(x, axis=0)                            # (C, HW)
    xq = jnp.sum(x * x, axis=0)                        # (C, HW)
    s = jnp.sum(xs, axis=-1, keepdims=True)            # (C, 1)
    sq = jnp.sum(xq, axis=-1, keepdims=True)           # (C, 1)
    mean = s * inv_count
    var = jnp.maximum(sq * inv_count - mean * mean, 0.0)
    scale = gamma_ref[...] * lax.rsqrt(var + eps)      # (C, 1)
    bias = beta_ref[...] - mean * scale                # (C, 1)
    y = x * scale[None, :, :] + bias[None, :, :]
    o_ref[...] = jnp.maximum(y, 0.0).astype(o_ref.dtype)


# ------------------------------ two-pass path --------------------------------


def _stats_kernel(x_ref, sum_ref, sumsq_ref, *, hw, hw_tile, mask_lanes):
    """Per-row sum(x) and sum(x^2), accumulated across the hw grid axis."""
    j = pl.program_id(1)
    x = x_ref[...].astype(jnp.float32)
    if mask_lanes:
        # Ragged hw tail: zero out lanes beyond the true hw extent so block
        # sums stay exact (the stale VMEM padding never contributes).
        lane = lax.broadcasted_iota(jnp.int32, x.shape, 1)
        x = jnp.where(j * hw_tile + lane < hw, x, 0.0)
    s = jnp.sum(x, axis=1, keepdims=True)        # (row_tile, 1)
    sq = jnp.sum(x * x, axis=1, keepdims=True)   # (row_tile, 1)

    @pl.when(j == 0)
    def _init():
        sum_ref[...] = s
        sumsq_ref[...] = sq

    @pl.when(j > 0)
    def _accumulate():
        sum_ref[...] += s
        sumsq_ref[...] += sq


def _apply_kernel(x_ref, scale_ref, bias_ref, o_ref):
    """y = max(x * scale + bias, 0); scale/bias are per-row, broadcast on lanes."""
    x = x_ref[...].astype(jnp.float32)
    y = x * scale_ref[...] + bias_ref[...]
    o_ref[...] = jnp.maximum(y, 0.0).astype(o_ref.dtype)


# --------------------------------- wrapper ------------------------------------


def bn_relu(x_nchw, gamma, beta, *, eps=BATCH_NORM_EPSILON,
            tile_budget_bytes=_TILE_BUDGET_BYTES,
            fused_max_bytes=_FUSED_MAX_BYTES):
    """BNReLU forward. x_nchw: (N, C, H, W). gamma/beta: (C,)."""
    n, c, h, w = x_nchw.shape
    nc, hw = n * c, h * w
    gamma32 = gamma.astype(jnp.float32)
    beta32 = beta.astype(jnp.float32)

    # ---- fused single-pass fast path: x stays VMEM-resident (2x HBM traffic) ----
    if nc * hw * 4 <= fused_max_bytes:
        x3d = x_nchw.reshape(n, c, hw)             # free reshape
        out3d = pl.pallas_call(
            functools.partial(_fused_kernel, inv_count=1.0 / float(n * hw), eps=eps),
            grid=(1,),
            in_specs=[
                pl.BlockSpec((n, c, hw), lambda i: (0, 0, 0)),
                pl.BlockSpec((c, 1), lambda i: (0, 0)),
                pl.BlockSpec((c, 1), lambda i: (0, 0)),
            ],
            out_specs=pl.BlockSpec((n, c, hw), lambda i: (0, 0, 0)),
            out_shape=jax.ShapeDtypeStruct((n, c, hw), x_nchw.dtype),
            compiler_params=pltpu.CompilerParams(
                dimension_semantics=("arbitrary",),
                vmem_limit_bytes=_VMEM_LIMIT_BYTES,
            ),
            cost_estimate=pl.CostEstimate(
                flops=6 * nc * hw,
                transcendentals=c,
                bytes_accessed=2 * nc * hw * x_nchw.dtype.itemsize,
            ),
        )(x3d, gamma32.reshape(c, 1), beta32.reshape(c, 1))
        return out3d.reshape(n, c, h, w)

    # ---- two-pass path ----
    x2d = x_nchw.reshape(nc, hw)                    # free reshape (keeps NCHW order)
    row_tile, hw_tile = _select_tiles(nc, hw, x2d.dtype.itemsize, tile_budget_bytes)
    grid = (pl.cdiv(nc, row_tile), pl.cdiv(hw, hw_tile))
    hw_ragged = (hw % hw_tile) != 0

    x_bytes = x2d.size * x2d.dtype.itemsize
    vec_bytes = nc * 4

    # pass 1: per-row sum / sum-of-squares (x read from HBM exactly once)
    row_sum, row_sumsq = pl.pallas_call(
        functools.partial(_stats_kernel, hw=hw, hw_tile=hw_tile, mask_lanes=hw_ragged),
        grid=grid,
        in_specs=[pl.BlockSpec((row_tile, hw_tile), lambda i, j: (i, j))],
        out_specs=(
            pl.BlockSpec((row_tile, 1), lambda i, j: (i, 0)),
            pl.BlockSpec((row_tile, 1), lambda i, j: (i, 0)),
        ),
        out_shape=(
            jax.ShapeDtypeStruct((nc, 1), jnp.float32),
            jax.ShapeDtypeStruct((nc, 1), jnp.float32),
        ),
        compiler_params=pltpu.CompilerParams(
            dimension_semantics=("parallel", "arbitrary"),
            vmem_limit_bytes=_VMEM_LIMIT_BYTES,
        ),
        cost_estimate=pl.CostEstimate(
            flops=3 * nc * hw,
            transcendentals=0,
            bytes_accessed=x_bytes + 2 * vec_bytes,
        ),
    )(x2d)

    # tiny per-channel glue (C-sized tensors; computed once, not per tile)
    count = float(n * hw)
    mean = row_sum.reshape(n, c).sum(axis=0) / count
    var = row_sumsq.reshape(n, c).sum(axis=0) / count - mean * mean
    var = jnp.maximum(var, 0.0)                     # guard cancellation round-off
    inv_std = lax.rsqrt(var + eps)
    scale = gamma32 * inv_std                       # folded affine: 3 ops/elem below
    bias = beta32 - mean * scale
    scale_rows = jnp.tile(scale, n).reshape(nc, 1)  # per-(n,c)-row copies
    bias_rows = jnp.tile(bias, n).reshape(nc, 1)

    # pass 2: normalize + affine + ReLU (x read once, output written once)
    out2d = pl.pallas_call(
        _apply_kernel,
        grid=grid,
        in_specs=[
            pl.BlockSpec((row_tile, hw_tile), lambda i, j: (i, j)),
            pl.BlockSpec((row_tile, 1), lambda i, j: (i, 0)),
            pl.BlockSpec((row_tile, 1), lambda i, j: (i, 0)),
        ],
        out_specs=pl.BlockSpec((row_tile, hw_tile), lambda i, j: (i, j)),
        out_shape=jax.ShapeDtypeStruct((nc, hw), x2d.dtype),
        compiler_params=pltpu.CompilerParams(
            dimension_semantics=("parallel", "parallel"),
            vmem_limit_bytes=_VMEM_LIMIT_BYTES,
        ),
        cost_estimate=pl.CostEstimate(
            flops=3 * nc * hw,
            transcendentals=0,
            bytes_accessed=2 * x_bytes + 2 * vec_bytes,
        ),
    )(x2d, scale_rows, bias_rows)

    return out2d.reshape(n, c, h, w)


def bn_relu_reference(x_nchw, gamma, beta):
    """Pure-JAX reference (training-mode batch norm + ReLU)."""
    x = x_nchw.astype(jnp.float32)
    mean = jnp.mean(x, axis=(0, 2, 3), keepdims=True)
    var = jnp.mean((x - mean) ** 2, axis=(0, 2, 3), keepdims=True)
    y = (x - mean) / jnp.sqrt(var + BATCH_NORM_EPSILON)
    y = y * gamma.reshape(1, -1, 1, 1) + beta.reshape(1, -1, 1, 1)
    return jnp.maximum(y, 0.0).astype(x_nchw.dtype)


if __name__ == "__main__":
    key = jax.random.PRNGKey(0)
    N, C, H, W = 2, 4, 16, 16

    x = jax.random.normal(key, (N, C, H, W), dtype=jnp.float32)
    # Parameters per BNReLU.__init__: weight (gamma) = 1 (init_zero=False),
    # bias (beta) = 0 (BatchNorm2d default).
    gamma = jnp.ones((C,), dtype=jnp.float32)
    beta = jnp.zeros((C,), dtype=jnp.float32)
    ref = bn_relu_reference(x, gamma, beta)

    # 1) default dispatch: fused single-pass (VMEM-resident) path at this size.
    out = jax.block_until_ready(bn_relu(x, gamma, beta))
    assert out.shape == (N, C, H, W) and out.dtype == x.dtype
    assert jnp.allclose(out, ref, atol=1e-4, rtol=1e-4), "fused path mismatch"

    # 2) force the tiled two-pass path on the same inputs.
    out2 = jax.block_until_ready(bn_relu(x, gamma, beta, fused_max_bytes=0))
    assert jnp.allclose(out2, ref, atol=1e-4, rtol=1e-4), "two-pass mismatch"

    # 3) odd spatial size (hw=196, not a multiple of 128) through the two-pass path.
    x3 = jax.random.normal(jax.random.PRNGKey(1), (2, 3, 14, 14), dtype=jnp.float32)
    g3 = jnp.full((3,), 1.5, jnp.float32)
    b3 = jnp.full((3,), 0.25, jnp.float32)
    out3 = jax.block_until_ready(bn_relu(x3, g3, b3, fused_max_bytes=0))
    assert jnp.allclose(out3, bn_relu_reference(x3, g3, b3), atol=1e-4, rtol=1e-4), \
        "odd-hw two-pass mismatch"

    # 4) ragged hw tiles (tiny budget forces hw_tile < hw) with in-kernel masking.
    x4 = jax.random.normal(jax.random.PRNGKey(2), (2, 4, 48, 56), dtype=jnp.float32)
    g4 = jnp.ones((4,), jnp.float32)
    b4 = jnp.zeros((4,), jnp.float32)
    out4 = jax.block_until_ready(
        bn_relu(x4, g4, b4, fused_max_bytes=0, tile_budget_bytes=64 * 1024))
    assert jnp.allclose(out4, bn_relu_reference(x4, g4, b4), atol=1e-4, rtol=1e-4), \
        "ragged-hw two-pass mismatch"

    print("KERNEL_OK")
</pallas_src>

<mosaic_0001>
module attributes {stable_mosaic.version = 11 : i64} {
  func.func @_fused_kernel(%arg0: i32, %arg1: memref<2x4x256xf32, #tpu.memory_space<vmem>>, %arg2: memref<4x1xf32, #tpu.memory_space<vmem>>, %arg3: memref<4x1xf32, #tpu.memory_space<vmem>>, %arg4: memref<2x4x256xf32, #tpu.memory_space<vmem>>) attributes {dimension_semantics = [#tpu.dimension_semantics<arbitrary>], iteration_bounds = array<i64: 1>, scalar_prefetch = 0 : i64, scratch_operands = 0 : i64, tpu.core_type = #tpu.core_type<tc>, window_params = [{pipeline_mode = #tpu.pipeline_mode<synchronous>, transform_indices = @transform_0, window_bounds = array<i64: 2, 4, 256>}, {pipeline_mode = #tpu.pipeline_mode<synchronous>, transform_indices = @transform_1, window_bounds = array<i64: 4, 1>}, {pipeline_mode = #tpu.pipeline_mode<synchronous>, transform_indices = @transform_2, window_bounds = array<i64: 4, 1>}, {pipeline_mode = #tpu.pipeline_mode<synchronous>, transform_indices = @transform_3, window_bounds = array<i64: 2, 4, 256>}]} {
    %c0 = arith.constant 0 : index
    %c0_0 = arith.constant 0 : index
    %c0_1 = arith.constant 0 : index
    %0 = vector.load %arg1[%c0, %c0_0, %c0_1] : memref<2x4x256xf32, #tpu.memory_space<vmem>>, vector<2x4x256xf32>
    %cst = arith.constant dense<0.000000e+00> : vector<4x256xf32>
    %1 = vector.multi_reduction <add>, %0, %cst [0] : vector<2x4x256xf32> to vector<4x256xf32>
    %2 = arith.mulf %0, %0 : vector<2x4x256xf32>
    %cst_2 = arith.constant dense<0.000000e+00> : vector<4x256xf32>
    %3 = vector.multi_reduction <add>, %2, %cst_2 [0] : vector<2x4x256xf32> to vector<4x256xf32>
    %cst_3 = arith.constant dense<0.000000e+00> : vector<4xf32>
    %4 = vector.multi_reduction <add>, %1, %cst_3 [1] : vector<4x256xf32> to vector<4xf32>
    %5 = vector.shape_cast %4 : vector<4xf32> to vector<4x1xf32>
    %cst_4 = arith.constant dense<0.000000e+00> : vector<4xf32>
    %6 = vector.multi_reduction <add>, %3, %cst_4 [1] : vector<4x256xf32> to vector<4xf32>
    %7 = vector.shape_cast %6 : vector<4xf32> to vector<4x1xf32>
    %cst_5 = arith.constant 0.001953125 : f32
    %8 = vector.broadcast %cst_5 : f32 to vector<4x1xf32>
    %9 = arith.mulf %5, %8 : vector<4x1xf32>
    %cst_6 = arith.constant 0.001953125 : f32
    %10 = vector.broadcast %cst_6 : f32 to vector<4x1xf32>
    %11 = arith.mulf %7, %10 : vector<4x1xf32>
    %12 = arith.mulf %9, %9 : vector<4x1xf32>
    %13 = arith.subf %11, %12 : vector<4x1xf32>
    %cst_7 = arith.constant 0.000000e+00 : f32
    %14 = vector.broadcast %cst_7 : f32 to vector<4x1xf32>
    %15 = arith.maximumf %13, %14 : vector<4x1xf32>
    %c0_8 = arith.constant 0 : index
    %c0_9 = arith.constant 0 : index
    %16 = vector.load %arg2[%c0_8, %c0_9] : memref<4x1xf32, #tpu.memory_space<vmem>>, vector<4x1xf32>
    %cst_10 = arith.constant 9.99999974E-6 : f32
    %17 = vector.broadcast %cst_10 : f32 to vector<4x1xf32>
    %18 = arith.addf %15, %17 : vector<4x1xf32>
    %19 = math.rsqrt %18 : vector<4x1xf32>
    %20 = arith.mulf %16, %19 : vector<4x1xf32>
    %c0_11 = arith.constant 0 : index
    %c0_12 = arith.constant 0 : index
    %21 = vector.load %arg3[%c0_11, %c0_12] : memref<4x1xf32, #tpu.memory_space<vmem>>, vector<4x1xf32>
    %22 = arith.mulf %9, %20 : vector<4x1xf32>
    %23 = arith.subf %21, %22 : vector<4x1xf32>
    %24 = vector.shape_cast %20 : vector<4x1xf32> to vector<1x4x1xf32>
    %25 = vector.broadcast %24 : vector<1x4x1xf32> to vector<2x4x256xf32>
    %26 = arith.mulf %0, %25 : vector<2x4x256xf32>
    %27 = vector.shape_cast %23 : vector<4x1xf32> to vector<1x4x1xf32>
    %28 = vector.broadcast %27 : vector<1x4x1xf32> to vector<2x4x256xf32>
    %29 = arith.addf %26, %28 : vector<2x4x256xf32>
    %cst_13 = arith.constant 0.000000e+00 : f32
    %30 = vector.broadcast %cst_13 : f32 to vector<2x4x256xf32>
    %31 = arith.maximumf %29, %30 : vector<2x4x256xf32>
    %c0_14 = arith.constant 0 : index
    %c0_15 = arith.constant 0 : index
    %c0_16 = arith.constant 0 : index
    %32 = vector.load %arg4[%c0_14, %c0_15, %c0_16] : memref<2x4x256xf32, #tpu.memory_space<vmem>>, vector<2x4x256xf32>
    tpu.vector_store %arg4[%c0_14, %c0_15, %c0_16], %31 {strides = array<i32>} : memref<2x4x256xf32, #tpu.memory_space<vmem>>, vector<2x4x256xf32>,
    return
  }
  func.func @transform_0(%arg0: i32) -> (i32, i32, i32) {
    %c0_i32 = arith.constant 0 : i32
    %c0_i32_0 = arith.constant 0 : i32
    %c0_i32_1 = arith.constant 0 : i32
    %c0_i32_2 = arith.constant 0 : i32
    return %c0_i32, %c0_i32_0, %c0_i32_1 : i32, i32, i32
  }
  func.func @transform_1(%arg0: i32) -> (i32, i32) {
    %c0_i32 = arith.constant 0 : i32
    %c0_i32_0 = arith.constant 0 : i32
    %c0_i32_1 = arith.constant 0 : i32
    return %c0_i32, %c0_i32_0 : i32, i32
  }
  func.func @transform_2(%arg0: i32) -> (i32, i32) {
    %c0_i32 = arith.constant 0 : i32
    %c0_i32_0 = arith.constant 0 : i32
    %c0_i32_1 = arith.constant 0 : i32
    return %c0_i32, %c0_i32_0 : i32, i32
  }
  func.func @transform_3(%arg0: i32) -> (i32, i32, i32) {
    %c0_i32 = arith.constant 0 : i32
    %c0_i32_0 = arith.constant 0 : i32
    %c0_i32_1 = arith.constant 0 : i32
    %c0_i32_2 = arith.constant 0 : i32
    return %c0_i32, %c0_i32_0, %c0_i32_1 : i32, i32, i32
  }
}

</mosaic_0001>

<bundles_post_ra>
// kernel: tpu_custom_call.1
= control target key start
LH: loop header
LB: loop body
LE: loop exit
PB: predicated region body
PF: predicated region fallthrough
CT: control target
= control target key end

     0   :  { %8 = vsyncpa [#allocation3], 0  ;;  %s263_s0 = inlined_call_operand.hbm [shape: f32[2,4,256], index: 0, kind: input, shape index: {}]   ;;  %s264_s1 = inlined_call_operand.vmem [shape: f32[4,1], index: 1, kind: input, shape index: {}]   ;;  %s265_s2 = inlined_call_operand.vmem [shape: f32[4,1], index: 2, kind: input, shape index: {}]   ;;  %s266_s3 = inlined_call_operand.hbm [shape: f32[2,4,256], index: 3, kind: output, shape index: {}]  }
   0x1   :  { %9 = vsyncpa [#allocation4], 0  ;;  %s189_s12 = smov [#allocation2]   ;;  %s141_s16 = scalar_lea.hbm %s263_s0, 256 }
   0x2   :  { %s15_s13 = sshll.u32 %s189_s12, 4  ;;  %p142_p0 = scmp.ne.s32.totalorder %s263_s0, %s141_s16  ;;  %s16_s13 = int_to_ptr.vmem [resolvable:$true] %s15_s13 }
   0x3   :  { %p145_p1 = scmp.lt.u32.totalorder %s141_s16, %s263_s0 }
   0x5   :  { %p147_p2 = pnand %p145_p1, %p142_p0 }
   0x7   :  { %150 = shalt.err (!%p147_p2)
}
   0x8   :  { %s151_s21 = scalar_lea.vmem %s16_s13, 256  ;;  %p156_p4 = scmp.lt.s32.totalorder %s16_s13, %s16_s13 }
   0x9   :  { %p152_p3 = scmp.ne.s32.totalorder %s16_s13, %s151_s21  ;;  %p157_p5 = scmp.lt.s32.totalorder %s151_s21, %s151_s21 }
   0xb   :  { %p158_p6 = por %p157_p5, %p156_p4 }
   0xd   :  { %p159_p7 = pnand %p158_p6, %p152_p3 }
   0xf   :  { %162 = shalt.err (!%p159_p7)
}
  0x10   :  { %s190_s22 = smov 128   ;;  %s191_s23 = smov 8  }
  0x11   :  { %21 = dma.hbm_to_vmem [thread:$0]  %s263_s0, 256, %s16_s13, [#allocation3], %s190_s22, %s190_s22, %s191_s23  }
  0x12   :  { %185 = dma.done.wait [#allocation3], 256  }
  0x13   :  { %186 = vsyncadd [#allocation3], 4294967040  ;;  %vm37_vm0 = vcmask 1043456   ;;  %v29_v0 = vld [vmem:[#allocation2] sm:$0xff]  ;;  %v30_v1 = vld [vmem:[#allocation2 + $0x8] sm:$0xff]  ;;  %v192_v26 = vmov 0   ;;  %v87_v43 = vlaneseq }
  0x14   :  { %v33_v2 = vcombine.high %v29_v0, %v29_v0  ;;  %v34_v3 = vcombine.high %v30_v1, %v30_v1  ;;  %v38_v4 = vsel %vm37_vm0, %v29_v0, 0.0  ;;  %v39_v5 = vsel %vm37_vm0, %v30_v1, 0.0  ;;  %135 = vset.pattern.permute.xlu1 %v192_v26  ;;  %136 = vset.pattern.permute.xlu0 %v192_v26  ;;  %v73_v35 = vld [vmem:[%s264_s1] sm:$0xf]  ;;  %s194_s1 = smov [#allocation5]  }
  0x15   :  { %v40_v6 = vadd.f32 %v39_v5, %v38_v4  ;;  %v44_v7 = vmul.f32 %v29_v0, %v29_v0  ;;  %v45_v8 = vmul.f32 %v30_v1, %v30_v1  ;;  %v77_v38 = vld [vmem:[%s265_s2] sm:$0xf]  ;;  %v193_v41 = vmov 839922192   ;;  %s117_s29 = sshll.u32 %s194_s1, 4  ;;  %s118_s29 = int_to_ptr.vmem [resolvable:$true] %s117_s29 }
  0x16   :  { %v41_v9 = vsel %vm37_vm0, %v33_v2, 0.0  ;;  %v42_v10 = vsel %vm37_vm0, %v34_v3, 0.0  ;;  %v85_v42 = vunpack.c.l.s4 %v193_v41  ;;  %v88_v45 = vshrl.u32 %v87_v43, 7  ;;  %s163_s2 = scalar_lea.vmem %s118_s29, 256  ;;  %p168_p9 = scmp.lt.s32.totalorder %s118_s29, %s118_s29 }
  0x17   :  { %v43_v11 = vadd.f32 %v42_v10, %v41_v9  ;;  %v58_v12 = vsel %vm37_vm0, %v40_v6, 0.0  ;;  %v48_v13 = vcombine.high %v44_v7, %v44_v7  ;;  %v49_v14 = vcombine.high %v45_v8, %v45_v8  ;;  %p164_p8 = scmp.ne.s32.totalorder %s118_s29, %s163_s2  ;;  %p169_p10 = scmp.lt.s32.totalorder %s163_s2, %s163_s2 }
  0x18   :  { %v52_v15 = vsel %vm37_vm0, %v44_v7, 0.0  ;;  %v53_v16 = vsel %vm37_vm0, %v45_v8, 0.0  ;;  %v86_v44 = vunpack.c.0.s8 %v85_v42 }
  0x19   :  { %v59_v17 = vsel %vm37_vm0, %v43_v11, 0.0  ;;  %v54_v18 = vadd.f32 %v53_v16, %v52_v15  ;;  %v55_v19 = vsel %vm37_vm0, %v48_v13, 0.0  ;;  %v56_v20 = vsel %vm37_vm0, %v49_v14, 0.0  ;;  %p170_p11 = por %p169_p10, %p168_p9 }
  0x1a   :  { %v60_v21 = vadd.f32 %v59_v17, %v58_v12  ;;  %v57_v22 = vadd.f32 %v56_v20, %v55_v19  ;;  %v89_v46 = vsub.s32 %v86_v44, %v88_v45 }
  0x1b   :  { %v63_v23 = vsel %vm37_vm0, %v54_v18, 0.0  ;;  %p171_p12 = pnand %p170_p11, %p164_p8 }
  0x1c   :  { %61 = vadd.xlane.f32.xlu0 %v60_v21  ;;  %v64_v24 = vsel %vm37_vm0, %v57_v22, 0.0 }
  0x1d   :  { %v65_v25 = vadd.f32 %v64_v24, %v63_v23 }
  0x20   :  { %66 = vadd.xlane.f32.xlu0 %v65_v25 }
  0xa9   :  { %v62_v27 = vpop.xlane.xlu0 %61 }
  0xaa   :  { %v68_v28 = vmul.f32 0.001953125, %v62_v27 }
  0xac   :  { %v70_v30 = vmul.f32 %v68_v28, %v68_v28 }
  0xad   :  { %v67_v29 = vpop.xlane.xlu0 %66 }
  0xae   :  { %v69_v31 = vmul.f32 0.001953125, %v67_v29 }
  0xb0   :  { %v71_v32 = vsub.f32 %v69_v31, %v70_v30 }
  0xb2   :  { %v72_v33 = vmax.f32 %v71_v32, 0.0 }
  0xb4   :  { %v74_v34 = vadd.f32 1e-05, %v72_v33 }
  0xb6   :  { %139 = vrsqrt.f32 %v74_v34 }
  0xc0   :  { %v140_v36 = vpop.eup %139 }
  0xc1   :  { %v76_v37 = vmul.f32 %v140_v36, %v73_v35 }
  0xc3   :  { %82 = vperm.xlu1 %135, %v76_v37   ;;  %v78_v39 = vmul.f32 %v76_v37, %v68_v28 }
  0xc5   :  { %v79_v40 = vsub.f32 %v77_v38, %v78_v39 }
  0xc7   :  { %96 = vperm.xlu1 %135, %v79_v40  }
 0x142   :  { %v83_v47 = vpop.permute.xlu1 %82 }
 0x143   :  { %v90_v48 = vrot.slane %v83_v47, %v89_v46 }
 0x145   :  { %v92_v50 = vmul.f32 %v90_v48, %v29_v0  ;;  %v93_v51 = vmul.f32 %v90_v48, %v30_v1 }
 0x146   :  { %v97_v49 = vpop.permute.xlu1 %96 }
 0x147   :  { %v104_v52 = vrot.slane %v97_v49, %v89_v46 }
 0x149   :  { %v106_v53 = vadd.f32 %v104_v52, %v92_v50  ;;  %v107_v54 = vadd.f32 %v104_v52, %v93_v51 }
 0x14b   :  { %v108_v55 = vmax.f32 %v106_v53, 0.0  ;;  %v109_v56 = vmax.f32 %v107_v54, 0.0 }
 0x14d   :  { %110 = vst [vmem:[#allocation5] sm:$0xff] %v108_v55  ;;  %111 = vst [vmem:[#allocation5 + $0x8] sm:$0xff] %v109_v56 }
 0x14e   :  { %174 = shalt.err (!%p171_p12)
}
 0x14f   :  { %s175_s5 = scalar_lea.hbm %s266_s3, 256 }
 0x150   :  { %p176_p13 = scmp.ne.s32.totalorder %s266_s3, %s175_s5  ;;  %p179_p0 = scmp.lt.u32.totalorder %s175_s5, %s266_s3 }
 0x152   :  { %p181_p1 = pnand %p179_p0, %p176_p13 }
 0x154   :  { %184 = shalt.err (!%p181_p1)
}
 0x155   :  { %123 = dma.vmem_to_hbm [thread:$0]  %s118_s29, 256, %s266_s3, [#allocation4], %s190_s22, %s190_s22, %s191_s23  }
 0x156   :  { %187 = dma.done.wait [#allocation4], 256  }
 0x157   :  { %188 = vsyncadd [#allocation4], 4294967040 }
 0x158   :  { %127 = vsyncpa [#allocation3], 1 }
 0x159   :  { %128 = vsyncpa [#allocation4], 1 }

</bundles_post_ra>
